<compile_context>
chip_gen: v7x
topology: tpu7x:2x2x1
jax: 0.10.0
libtpu: 0.0.40
codegen_flags: <defaults>
</compile_context>

<pallas_src>
import functools

import jax
import jax.numpy as jnp
from jax.experimental import pallas as pl
from jax.experimental.pallas import tpu as pltpu


# ----------------------------------------------------------------------------
# Kernels
# ----------------------------------------------------------------------------
def _resident_kernel(x_ref, w_ref, b_ref, o_ref, *, compute_dtype):
    """Single-shot per-block linear: full-K dot + bias, no accumulator scratch.

    x_ref: (tm, hidden_in)   w_ref: (hidden_in, tn)   b_ref: (1, tn)
    o_ref: (tm, tn)
    Operands are cast to bf16 in-register for the MXU; accumulation and the
    bias epilogue stay f32 (also safe on v5e's non-bf16 VPU).
    """
    acc = jnp.dot(
        x_ref[...].astype(compute_dtype),
        w_ref[...].astype(compute_dtype),
        preferred_element_type=jnp.float32,
    )
    o_ref[...] = (acc + b_ref[...].astype(jnp.float32)).astype(o_ref.dtype)


def _streaming_kernel(x_ref, w_ref, b_ref, o_ref, acc_ref, *, compute_dtype):
    """K-tiled fallback (weight too large for VMEM): fp32 VMEM accumulator,
    K axis innermost with pl.when init / finalize."""
    k = pl.program_id(3)

    @pl.when(k == 0)
    def _():
        acc_ref[...] = jnp.zeros_like(acc_ref)

    acc_ref[...] += jnp.dot(
        x_ref[...].astype(compute_dtype),
        w_ref[...].astype(compute_dtype),
        preferred_element_type=jnp.float32,
    )

    @pl.when(k == pl.num_programs(3) - 1)
    def _():
        o_ref[...] = (acc_ref[...] + b_ref[...].astype(jnp.float32)).astype(
            o_ref.dtype
        )


# ----------------------------------------------------------------------------
# Planning helpers
# ----------------------------------------------------------------------------
def _vmem_limit_bytes():
    """Generation-aware VMEM budget: v7x has 64 MiB per TensorCore, v5e/v6e
    have 128 MiB.  Use ~3/4 of physical, capped at 100 MiB."""
    cap = 0
    try:
        cap = int(pltpu.get_tpu_info().vmem_capacity_bytes)
    except Exception:
        cap = 0
    if not cap:
        try:
            kind = jax.devices()[0].device_kind.lower()
        except Exception:
            kind = ""
        cap = (64 << 20) if ("v7" in kind or "7x" in kind) else (128 << 20)
    return min((cap * 3) // 4, 100 << 20)


def _pick_tile(dim, target, granule):
    """Largest tile <= target that divides `dim` and is a multiple of
    `granule` (128 for lane dims, 8 for f32 sublane dims); otherwise the full
    dim (a full-extent block is always layout-legal)."""
    if dim <= target:
        return dim
    t = (target // granule) * granule
    while t >= granule:
        if dim % t == 0:
            return t
        t -= granule
    return dim


# ----------------------------------------------------------------------------
# Wrapper (Master.forward equivalent)
# ----------------------------------------------------------------------------
@functools.partial(jax.jit, static_argnames=("compute_dtype",))
def master_forward(x, weights, biases, *, compute_dtype=jnp.bfloat16):
    """Pallas equivalent of Master.forward.

    Args:
      x:       [nworkers, batch, hidden_in]       one input slab per worker.
      weights: [nworkers, hidden_in, hidden_out]  per-worker weight (x @ w).
      biases:  [nworkers, 1, hidden_out]          per-worker bias.

    Returns:
      [nworkers, batch, hidden_out]; out[i] corresponds to the i-th future
      .wait()-ed in the original Master.forward.
    """
    nworkers, batch, hidden_in = x.shape
    hidden_out = weights.shape[-1]
    out_dtype = x.dtype

    x_it = jnp.dtype(x.dtype).itemsize
    w_it = jnp.dtype(weights.dtype).itemsize
    b_it = jnp.dtype(biases.dtype).itemsize
    o_it = jnp.dtype(out_dtype).itemsize

    vmem_limit = _vmem_limit_bytes()
    fit_budget = vmem_limit - (4 << 20)  # headroom for Mosaic internals
    flops = 2 * nworkers * batch * hidden_in * hidden_out

    # ------------------------------------------------------------------
    # Path 1: weight-resident (preferred).  K collapsed (tk = hidden_in),
    # tn = hidden_out if it fits.  Grid (worker, N-panel, M-tile) with the
    # M-tile axis innermost so the weight block index is unchanged between
    # consecutive steps -> W DMA'd once per (worker, panel) and reused.
    # ------------------------------------------------------------------
    def _resident_plan():
        tn = hidden_out
        tm = _pick_tile(batch, 512, 8)

        def fits(tm_, tn_):
            xb = 2 * tm_ * hidden_in * x_it          # double-buffered x tile
            wb = 2 * hidden_in * tn_ * w_it          # resident weight panel
            bb = 2 * tn_ * b_it
            ob = 2 * tm_ * tn_ * o_it
            return xb + wb + bb + ob <= fit_budget

        while not fits(tm, tn) and tm >= 16 and tm % 16 == 0:
            tm //= 2                                  # keeps x read exactly once
        if not fits(tm, tn):
            tn = _pick_tile(hidden_out, 2048, 128)
            while not fits(tm, tn) and tn >= 256 and tn % 256 == 0:
                tn //= 2
        if not fits(tm, tn):
            return None
        return tm, tn

    plan = _resident_plan()

    if plan is not None:
        tm, tn = plan
        n_i = batch // tm
        n_j = hidden_out // tn
        # v7x has 2 TensorCores: make sure the parallel grid has >= 2 blocks.
        while nworkers * n_j * n_i < 2 and tm % 16 == 0:
            tm //= 2
            n_i = batch // tm

        grid = (nworkers, n_j, n_i)  # M innermost -> weight block reused.
        bytes_accessed = (
            x.size * x_it * n_j                               # x per N panel
            + nworkers * hidden_in * hidden_out * w_it        # W read once
            + biases.size * b_it
            + nworkers * batch * hidden_out * o_it
        )
        cost = pl.CostEstimate(
            flops=flops, transcendentals=0, bytes_accessed=int(bytes_accessed)
        )
        kernel = functools.partial(_resident_kernel, compute_dtype=compute_dtype)

        return pl.pallas_call(
            kernel,
            out_shape=jax.ShapeDtypeStruct(
                (nworkers, batch, hidden_out), out_dtype
            ),
            grid_spec=pltpu.PrefetchScalarGridSpec(
                num_scalar_prefetch=0,
                grid=grid,
                in_specs=[
                    # x: full K, depends on (worker, m-tile); worker squeezed.
                    pl.BlockSpec((None, tm, hidden_in),
                                 lambda w, j, i: (w, i, 0)),
                    # weight panel: invariant in the innermost M axis ->
                    # genuinely reused, not re-DMA'd.
                    pl.BlockSpec((None, hidden_in, tn),
                                 lambda w, j, i: (w, 0, j)),
                    # bias: invariant in the M axis.
                    pl.BlockSpec((None, 1, tn), lambda w, j, i: (w, 0, j)),
                ],
                out_specs=pl.BlockSpec((None, tm, tn),
                                       lambda w, j, i: (w, i, j)),
            ),
            compiler_params=pltpu.CompilerParams(
                dimension_semantics=("parallel", "parallel", "parallel"),
                vmem_limit_bytes=vmem_limit,
            ),
            cost_estimate=cost,
        )(x, weights, biases)

    # ------------------------------------------------------------------
    # Path 2: K-tiled streaming fallback (weight panel does not fit VMEM).
    # ------------------------------------------------------------------
    tm = _pick_tile(batch, 512, 8)
    tn = _pick_tile(hidden_out, 512, 128)
    tk = _pick_tile(hidden_in, 1024, 128)

    def _stream_bytes(tm_, tn_, tk_):
        return (
            2 * (tm_ * tk_ * x_it + tk_ * tn_ * w_it + tn_ * b_it
                 + tm_ * tn_ * o_it)
            + tm_ * tn_ * 4  # fp32 accumulator
        )

    while _stream_bytes(tm, tn, tk) > fit_budget and tk >= 256 and tk % 256 == 0:
        tk //= 2
    while _stream_bytes(tm, tn, tk) > fit_budget and tm >= 16 and tm % 16 == 0:
        tm //= 2

    n_i, n_j, n_k = batch // tm, hidden_out // tn, hidden_in // tk
    grid = (nworkers, n_i, n_j, n_k)
    bytes_accessed = (
        x.size * x_it * n_j
        + weights.size * w_it * n_i
        + biases.size * b_it
        + nworkers * batch * hidden_out * o_it
    )
    cost = pl.CostEstimate(
        flops=flops, transcendentals=0, bytes_accessed=int(bytes_accessed)
    )
    kernel = functools.partial(_streaming_kernel, compute_dtype=compute_dtype)

    return pl.pallas_call(
        kernel,
        out_shape=jax.ShapeDtypeStruct((nworkers, batch, hidden_out), out_dtype),
        grid_spec=pltpu.PrefetchScalarGridSpec(
            num_scalar_prefetch=0,
            grid=grid,
            in_specs=[
                # 3-deep buffering on the K-streamed operands hides DMA
                # latency behind the short per-tile matmuls.
                pl.BlockSpec((None, tm, tk), lambda w, i, j, k: (w, i, k),
                             pipeline_mode=pl.Buffered(3)),
                pl.BlockSpec((None, tk, tn), lambda w, i, j, k: (w, k, j),
                             pipeline_mode=pl.Buffered(3)),
                pl.BlockSpec((None, 1, tn), lambda w, i, j, k: (w, 0, j)),
            ],
            out_specs=pl.BlockSpec((None, tm, tn),
                                   lambda w, i, j, k: (w, i, j)),
            scratch_shapes=[pltpu.VMEM((tm, tn), jnp.float32)],
        ),
        compiler_params=pltpu.CompilerParams(
            dimension_semantics=("parallel", "parallel", "parallel", "arbitrary"),
            vmem_limit_bytes=vmem_limit,
        ),
        cost_estimate=cost,
    )(x, weights, biases)


# ----------------------------------------------------------------------------
# Demo / correctness check
# ----------------------------------------------------------------------------
if __name__ == "__main__":
    nworkers = 2
    batch = 8
    hidden = 128

    key = jax.random.PRNGKey(0)
    kx, kw, kb = jax.random.split(key, 3)

    # Deterministic synthetic inputs / per-worker linear params
    # (pre-transposed so the kernel computes x @ w).
    x = jax.random.normal(kx, (nworkers, batch, hidden), dtype=jnp.float32)
    w = jax.random.normal(kw, (nworkers, hidden, hidden), dtype=jnp.float32) * 0.02
    b = jax.random.normal(kb, (nworkers, 1, hidden), dtype=jnp.float32) * 0.02

    out = master_forward(x, w, b)
    jax.block_until_ready(out)

    # Reference in plain JAX, matching the kernel's bf16-operand / f32-accum
    # numerics.
    x_bf = x.astype(jnp.bfloat16).astype(jnp.float32)
    w_bf = w.astype(jnp.bfloat16).astype(jnp.float32)
    ref = jnp.einsum("wbh,whk->wbk", x_bf, w_bf) + b

    assert out.shape == (nworkers, batch, hidden)
    assert jnp.allclose(out, ref, atol=5e-3, rtol=5e-3)

    print("KERNEL_OK")
</pallas_src>

<mosaic_0001>
module attributes {stable_mosaic.version = 11 : i64} {
  func.func @_resident_kernel(%arg0: i32, %arg1: i32, %arg2: i32, %arg3: memref<1x8x128xf32, #tpu.memory_space<vmem>>, %arg4: memref<1x128x128xf32, #tpu.memory_space<vmem>>, %arg5: memref<1x1x128xf32, #tpu.memory_space<vmem>>, %arg6: memref<1x8x128xf32, #tpu.memory_space<vmem>>) attributes {dimension_semantics = [#tpu.dimension_semantics<parallel>, #tpu.dimension_semantics<parallel>, #tpu.dimension_semantics<parallel>], iteration_bounds = array<i64: 2, 1, 1>, scalar_prefetch = 0 : i64, scratch_operands = 0 : i64, tpu.core_type = #tpu.core_type<tc>, window_params = [{transform_indices = @transform_0, window_bounds = array<i64: 1, 8, 128>}, {transform_indices = @transform_1, window_bounds = array<i64: 1, 128, 128>}, {transform_indices = @transform_2, window_bounds = array<i64: 1, 1, 128>}, {transform_indices = @transform_3, window_bounds = array<i64: 1, 8, 128>}]} {
    %c0 = arith.constant 0 : index
    %c0_0 = arith.constant 0 : index
    %c0_1 = arith.constant 0 : index
    %0 = vector.load %arg3[%c0, %c0_0, %c0_1] : memref<1x8x128xf32, #tpu.memory_space<vmem>>, vector<1x8x128xf32>
    %1 = vector.shape_cast %0 : vector<1x8x128xf32> to vector<8x128xf32>
    %2 = arith.truncf %1 : vector<8x128xf32> to vector<8x128xbf16>
    %c0_2 = arith.constant 0 : index
    %c0_3 = arith.constant 0 : index
    %c0_4 = arith.constant 0 : index
    %3 = vector.load %arg4[%c0_2, %c0_3, %c0_4] : memref<1x128x128xf32, #tpu.memory_space<vmem>>, vector<1x128x128xf32>
    %4 = vector.shape_cast %3 : vector<1x128x128xf32> to vector<128x128xf32>
    %5 = arith.truncf %4 : vector<128x128xf32> to vector<128x128xbf16>
    %cst = arith.constant dense<0.000000e+00> : vector<8x128xf32>
    %6 = tpu.matmul %2, %5, %cst {dimension_numbers = #tpu.dot_dimension_numbers<[1], [0], [0], [1], [0, 0, 1, 1], [], []>} : vector<8x128xbf16>, vector<128x128xbf16>, vector<8x128xf32> -> vector<8x128xf32>
    %c0_5 = arith.constant 0 : index
    %c0_6 = arith.constant 0 : index
    %c0_7 = arith.constant 0 : index
    %7 = vector.load %arg5[%c0_5, %c0_6, %c0_7] : memref<1x1x128xf32, #tpu.memory_space<vmem>>, vector<1x1x128xf32>
    %8 = vector.shape_cast %7 : vector<1x1x128xf32> to vector<1x128xf32>
    %9 = vector.broadcast %8 : vector<1x128xf32> to vector<8x128xf32>
    %10 = arith.addf %6, %9 : vector<8x128xf32>
    %c0_8 = arith.constant 0 : index
    %c0_9 = arith.constant 0 : index
    %c0_10 = arith.constant 0 : index
    %11 = vector.load %arg6[%c0_8, %c0_9, %c0_10] : memref<1x8x128xf32, #tpu.memory_space<vmem>>, vector<1x8x128xf32>
    %12 = vector.shape_cast %11 : vector<1x8x128xf32> to vector<8x128xf32>
    %13 = vector.shape_cast %10 : vector<8x128xf32> to vector<1x8x128xf32>
    tpu.vector_store %arg6[%c0_8, %c0_9, %c0_10], %13 {strides = array<i32>} : memref<1x8x128xf32, #tpu.memory_space<vmem>>, vector<1x8x128xf32>,
    return
  }
  func.func @transform_0(%arg0: i32, %arg1: i32, %arg2: i32) -> (i32, i32, i32) {
    %c0_i32 = arith.constant 0 : i32
    %c0_i32_0 = arith.constant 0 : i32
    return %arg0, %arg2, %c0_i32 : i32, i32, i32
  }
  func.func @transform_1(%arg0: i32, %arg1: i32, %arg2: i32) -> (i32, i32, i32) {
    %c0_i32 = arith.constant 0 : i32
    %c0_i32_0 = arith.constant 0 : i32
    return %arg0, %c0_i32, %arg1 : i32, i32, i32
  }
  func.func @transform_2(%arg0: i32, %arg1: i32, %arg2: i32) -> (i32, i32, i32) {
    %c0_i32 = arith.constant 0 : i32
    %c0_i32_0 = arith.constant 0 : i32
    return %arg0, %c0_i32, %arg1 : i32, i32, i32
  }
  func.func @transform_3(%arg0: i32, %arg1: i32, %arg2: i32) -> (i32, i32, i32) {
    %c0_i32 = arith.constant 0 : i32
    return %arg0, %arg2, %arg1 : i32, i32, i32
  }
}

</mosaic_0001>

<bundles_post_ra>
// kernel: master_forward.1
= control target key start
LH: loop header
LB: loop body
LE: loop exit
PB: predicated region body
PF: predicated region fallthrough
CT: control target
= control target key end

     0   :  { %s1115_s0 = inlined_call_operand.hbm [shape: f32[2,8,128], index: 0, kind: input, shape index: {}]   ;;  %s1116_s1 = inlined_call_operand.hbm [shape: f32[2,128,128], index: 1, kind: input, shape index: {}]   ;;  %s1117_s2 = inlined_call_operand.hbm [shape: f32[2,1,128], index: 2, kind: input, shape index: {}]   ;;  %s1118_s3 = inlined_call_operand.hbm [shape: f32[2,8,128], index: 3, kind: output, shape index: {}]  }
   0x1   :  { %1123 = sst [smem:[#allocation13_spill]] %s1116_s1 }
   0x2   :  { %8 = vsyncpa [#allocation3], 0 }
   0x3   :  { %10 = vsyncpa [#allocation3 + $0x1], 0 }
   0x4   :  { %11 = vsyncpa [#allocation6], 0 }
   0x5   :  { %13 = vsyncpa [#allocation6 + $0x1], 0 }
   0x6   :  { %14 = vsyncpa [#allocation4], 0 }
   0x7   :  { %16 = vsyncpa [#allocation4 + $0x1], 0  ;;  %s838_s12 = smov 0   ;;  %s840_s13 = smov 0  }
   0x8   :  { %s842_s14 = smov 0   ;;  %s844_s15 = smov 0  }
   0x9   :  { %s846_s16 = smov 0   ;;  %s848_s17 = smov 0  }
   0xa LB: > { %s869_s18 = sadd.s32 4294967295, %s808_s17   ;;  %s508_s19 = sadd.s32 4294967294, %s808_s17   ;;  %s808_s17 = sphi %s848_s17, %s22_s17   ;;  %s804_s16 = sphi %s846_s16, %s1144_s16   ;;  %s800_s15 = sphi %s844_s15, %s1143_s15   ;;  %s796_s14 = sphi %s842_s14, %s1142_s14   ;;  %s792_s13 = sphi %s840_s13, %s1141_s13   ;;  %s788_s12 = sphi %s838_s12, %s1140_s12  }
   0xb   : > { %s41_s20 = sadd.s32 1, %s804_s16  ;;  %s50_s21 = sadd.s32 1, %s796_s14 }
   0xc   : > { %p43_p0 = scmp.ge.s32.totalorder %s41_s20, 2  ;;  %p57_p1 = scmp.ne.s32.totalorder %s796_s14, %s792_s13 }
   0xd   : > { %p58_p2 = scmp.eq.s32.totalorder %s808_s17, 0  ;;  %p63_p3 = scmp.ne.s32.totalorder %s792_s13, %s788_s12 }
   0xe   : > { %s1146_s20 = smov (%p43_p0, %s41_s20), 0  ;;  %p64_p5 = scmp.eq.s32.totalorder %s869_s18, 0 }
   0xf   : > { %1124 = sst [smem:[#allocation12_spill]] %s1146_s20  ;;  %p881_p4 = por %p58_p2, %p57_p1 }
  0x10   : > { %s45_s23 = ssub.s32 %s804_s16, %s1146_s20  ;;  %p147_p6 = scmp.eq.s32.totalorder %s869_s18, 1 }
  0x11   : > { %p48_p7 = scmp.eq.s32.totalorder %s45_s23, 0  ;;  %p889_p8 = por %p64_p5, %p63_p3 }
  0x12   : > { %p893_p9 = por %p147_p6, %p57_p1  ;;  %p153_p10 = scmp.eq.s32.totalorder %s508_s19, 1 }
  0x13   : > { %s1126_s24 = scalar_select %p889_p8, 1, 0 }
  0x14   : > { %s1127_s25 = scalar_select %p893_p9, 1, 0 }
  0x15   : > { %s898_s26 = scalar_select %p48_p7, %s796_s14, %s50_s21  }
  0x16   : > { %p900_p11 = por %p153_p10, %p63_p3  ;;  %p578_p13 = scmp.lt.s32.totalorder %s808_s17, 2 }
  0x17   : > { %s907_s28 = sand.u32 1, %s796_s14   ;;  %s192_s29 = sand.u32 1, %s808_s17  }
  0x18   : > { %s1128_s27 = scalar_select %p900_p11, 1, 0 }
  0x19   : > { %s513_s30 = sshll.u32 %s907_s28, 7  ;;  %p913_p0 = pnand %p578_p13, %p881_p4 }
  0x1a   : > { %s526_s5 = sshll.u32 %s804_s16, 11  ;;  %s1130_s1 = sld [smem:[#allocation13_spill]] }
  0x1b   : > { %s1129_s4 = scalar_select %p913_p0, 1, 0 }
  0x1c   : > { %s196_s9 = scalar_lea.vmem [#allocation5], %s513_s30  ;;  %s925_s11 = scalar_lea.sflag [#allocation6], %s192_s29 }
  0x1d   : > { %s204_s10 = sshll.u32 %s196_s9, 4  ;;  %p931_p2 = pneg %p913_p0  ;;  %s923_s10 = int_to_ptr.vmem [resolvable:$true] %s204_s10 }
  0x20   : > { %s921_s8 = scalar_lea.hbm %s1130_s1, %s526_s5  ;;  %s637_s30 = scalar_lea.hbm %s1130_s1, 4096 }
  0x21   : > { %s632_s19 = scalar_lea.hbm %s921_s8, 2048  ;;  %p638_p5 = scmp.lt.u32.totalorder %s921_s8, %s1130_s1 }
  0x22   : > { %p633_p1 = scmp.ne.s32.totalorder %s921_s8, %s632_s19  ;;  %p639_p6 = scmp.lt.u32.totalorder %s637_s30, %s632_s19 }
  0x23   : > { %p641_p10 = scmp.lt.u32.totalorder %s632_s19, %s921_s8 }
  0x24   : > { %p635_p3 = pnand %p931_p2, %p633_p1  ;;  %p640_p7 = por %p639_p6, %p638_p5 }
  0x26   : > { %p636_p4 = pneg %p635_p3  ;;  %p642_p13 = por %p641_p10, %p640_p7 }
  0x28   : > { %p643_p12 = pnand %p642_p13, %p636_p4 }
  0x2a   : > { %646 = shalt.err (!%p643_p12)
}
  0x2b   : > { %s647_s29 = scalar_lea.vmem %s923_s10, 2048  ;;  %s810_s7 = smov [#allocation5]  }
  0x2c   : > { %p648_p1 = scmp.ne.s32.totalorder %s923_s10, %s647_s29  ;;  %s652_s9 = sshll.u32 %s810_s7, 4  ;;  %s653_s9 = int_to_ptr.vmem [resolvable:$false] %s652_s9 }
  0x2d   : > { %s654_s22 = scalar_lea.vmem %s653_s9, 4096  ;;  %p655_p9 = scmp.lt.s32.totalorder %s923_s10, %s653_s9 }
  0x2e   : > { %p650_p3 = pnand %p648_p1, %p931_p2  ;;  %p656_p8 = scmp.lt.s32.totalorder %s654_s22, %s647_s29 }
  0x30   : > { %p651_p11 = pneg %p650_p3  ;;  %p657_p5 = por %p656_p8, %p655_p9 }
  0x32   : > { %p658_p6 = pnand %p657_p5, %p651_p11 }
  0x34   : > { %661 = shalt.err (!%p658_p6)
}
  0x35   : > { %s811_s19 = smov 128   ;;  %s812_s23 = smov 8  }
  0x36   : > { %570 = dma.hbm_to_vmem [thread:$0]  (!%p913_p0), %s921_s8, 2048, %s923_s10, %s925_s11, %s811_s19, %s811_s19, %s812_s23  }
  0x37   : > { %p517_p12 = scmp.ge.s32.totalorder %s808_s17, 1  ;;  %p230_p4 = scmp.lt.s32.totalorder %s808_s17, 3 }
  0x38   : > { %s511_s5 = sshll.u32 %s907_s28, 3  ;;  %s512_s6 = sshll.u32 %s804_s16, 7 }
  0x39   : > { %p957_p8 = pnand %p517_p12, %p230_p4  ;;  %s966_s9 = scalar_lea.hbm %s1115_s0, %s512_s6 }
  0x3a   : > { %s177_s22 = scalar_lea.vmem [#allocation2], %s511_s5  ;;  %s516_s8 = sshll.u32 %s804_s16, 4 }
  0x3b   : > { %s1132_s30 = scalar_select %p957_p8, 1, 0 }
  0x3c   : > { %s185_s1 = sshll.u32 %s177_s22, 4  ;;  %s174_s10 = scalar_lea.sflag [#allocation3], %s907_s28  ;;  %s968_s1 = int_to_ptr.vmem [resolvable:$true] %s185_s1 }
  0x3d   : > { %s662_s19 = scalar_lea.hbm %s966_s9, 128  ;;  %s667_s6 = scalar_lea.hbm %s1115_s0, 256 }
  0x3e   : > { %p663_p9 = scmp.ne.s32.totalorder %s966_s9, %s662_s19  ;;  %p668_p10 = scmp.lt.u32.totalorder %s966_s9, %s1115_s0 }
  0x3f   : > { %p669_p13 = scmp.lt.u32.totalorder %s667_s6, %s662_s19  ;;  %p671_p3 = scmp.lt.u32.totalorder %s662_s19, %s966_s9 }
  0x40   : > { %p665_p11 = pnand %p663_p9, %p931_p2 }
  0x41   : > { %p670_p1 = por %p669_p13, %p668_p10 }
  0x42   : > { %p666_p7 = pneg %p665_p11 }
  0x43   : > { %p672_p5 = por %p671_p3, %p670_p1 }
  0x45   : > { %p673_p6 = pnand %p672_p5, %p666_p7 }
  0x47   : > { %676 = shalt.err (!%p673_p6)
}
  0x48   : > { %s677_s5 = scalar_lea.vmem %s968_s1, 128  ;;  %s813_s20 = smov [#allocation2]  }
  0x49   : > { %p678_p12 = scmp.ne.s32.totalorder %s968_s1, %s677_s5  ;;  %s682_s22 = sshll.u32 %s813_s20, 4  ;;  %s683_s22 = int_to_ptr.vmem [resolvable:$false] %s682_s22 }
  0x4a   : > { %s684_s23 = scalar_lea.vmem %s683_s22, 256  ;;  %p685_p11 = scmp.lt.s32.totalorder %s968_s1, %s683_s22 }
  0x4b   : > { %p680_p4 = pnand %p678_p12, %p931_p2  ;;  %p686_p8 = scmp.lt.s32.totalorder %s684_s23, %s677_s5 }
  0x4d   : > { %p681_p9 = pneg %p680_p4  ;;  %p687_p10 = por %p686_p8, %p685_p11 }
  0x4f   : > { %p688_p13 = pnand %p687_p10, %p681_p9 }
  0x51   : > { %691 = shalt.err (!%p688_p13)
}
  0x52   : > { %567 = dma.hbm_to_vmem [thread:$0]  (!%p913_p0), %s966_s9, 128, %s968_s1, %s174_s10  }
  0x53   : > { %s998_s29 = scalar_lea.hbm %s1117_s2, %s516_s8  ;;  %s217_s7 = scalar_lea.vmem [#allocation7], %s907_s28 }
  0x54   : > { %s225_s5 = sshll.u32 %s217_s7, 4  ;;  %s692_s20 = scalar_lea.hbm %s998_s29, 16  ;;  %s226_s5 = int_to_ptr.vmem [resolvable:$true] %s225_s5 }
  0x55   : > { %p693_p8 = scmp.ne.s32.totalorder %s998_s29, %s692_s20  ;;  %s697_s9 = scalar_lea.hbm %s1117_s2, 32 }
  0x56   : > { %p698_p3 = scmp.lt.u32.totalorder %s998_s29, %s1117_s2  ;;  %p699_p5 = scmp.lt.u32.totalorder %s697_s9, %s692_s20 }
  0x57   : > { %p695_p7 = pnand %p693_p8, %p931_p2  ;;  %p701_p12 = scmp.lt.u32.totalorder %s692_s20, %s998_s29 }
  0x58   : > { %p700_p6 = por %p699_p5, %p698_p3 }
  0x59   : > { %p696_p1 = pneg %p695_p7 }
  0x5a   : > { %p702_p4 = por %p701_p12, %p700_p6 }
  0x5c   : > { %p703_p9 = pnand %p702_p4, %p696_p1 }
  0x5e   : > { %706 = shalt.err (!%p703_p9)
}
  0x5f   : > { %s707_s28 = scalar_lea.vmem %s226_s5, 16  ;;  %s814_s8 = smov [#allocation7]  }
  0x60   : > { %p708_p11 = scmp.ne.s32.totalorder %s226_s5, %s707_s28  ;;  %s712_s19 = sshll.u32 %s814_s8, 4  ;;  %s713_s19 = int_to_ptr.vmem [resolvable:$false] %s712_s19 }
  0x61   : > { %s714_s6 = scalar_lea.vmem %s713_s19, 32  ;;  %p715_p8 = scmp.lt.s32.totalorder %s226_s5, %s713_s19 }
  0x62   : > { %p710_p10 = pnand %p708_p11, %p931_p2  ;;  %p716_p7 = scmp.lt.s32.totalorder %s714_s6, %s707_s28 }
  0x64   : > { %p711_p13 = pneg %p710_p10  ;;  %p717_p0 = por %p716_p7, %p715_p8 }
  0x66   : > { %p718_p3 = pnand %p717_p0, %p711_p13 }
  0x68   : > { %721 = shalt.err (!%p718_p3)
}
  0x69   : > { %p1133_p5 = scmp.ne.s32.totalorder %s1129_s4, 0  ;;  %p1134_p1 = scmp.ne.s32.totalorder %s1132_s30, 0 }
  0x6a   : > { %s1022_s21 = sand.u32 (!%p1134_p1), 1, %s792_s13   ;;  %p1135_p0 = scmp.ne.s32.totalorder (!%p1134_p1), %s1126_s24, 0 }
  0x6b   : > { %573 = dma.hbm_to_vmem [thread:$0]  (!%p1133_p5), %s998_s29, 16, %s226_s5, %s925_s11  }
  0x6c   : > { %234 = sbr.rel (%p1134_p1) target bundleno = 381 (0x17d), region = 32  ;;  %s518_s7 = sshll.u32 (!%p1134_p1), %s1022_s21, 3 }
  0x6d   : > { %s237_s20 = scalar_lea.sflag (!%p1134_p1), [#allocation3], %s1022_s21  ;;  %s1028_s22 = scalar_lea.vmem (!%p1134_p1), [#allocation2], %s518_s7 }
  0x73   : > { %775 = dma.done.wait (%p1135_p0), %s237_s20, 128  }
  0x74   : > { %777 = vsyncadd (%p1135_p0), %s237_s20, 4294967168  ;;  %s245_s4 = sand.u32 1, %s869_s18   ;;  %s519_s11 = sshll.u32 %s1022_s21, 7 }
  0x75   : > { %s246_s30 = scalar_lea.sflag [#allocation6], %s245_s4  ;;  %s1036_s29 = scalar_lea.vmem [#allocation5], %s519_s11 }
  0x76   : > { %779 = dma.done.wait (%p1135_p0), %s246_s30, 2064  }
  0x77   : > { %781 = vsyncadd (%p1135_p0), %s246_s30, 4294965232  ;;  %v815_v0 = vmov 0.0   ;;  %vm816_vm0 = vmmov 0   ;;  %v292_v1 = vld [vmem:[%s1036_s29] sm:$0xff]  ;;  %v293_v2 = vld [vmem:[%s1036_s29 + $0x8] sm:$0xff]  ;;  %s257_s18 = scalar_lea.vmem [#allocation7], %s1022_s21 }
  0x78   : > { %536 = vmatprep.subr.bf16.mxu0 %v815_v0  ;;  %552 = vmatprep.mubr.msk.bf16.mxu0 %vm816_vm0, %v815_v0  ;;  %v294_v3 = vld [vmem:[%s1036_s29 + $0x10] sm:$0xff]  ;;  %v308_v4 = vpack.c.bf16 %v293_v2, %v292_v1  ;;  %v295_v5 = vld [vmem:[%s1036_s29 + $0x18] sm:$0xff]  ;;  %v296_v7 = vld [vmem:[%s1036_s29 + $0x20] sm:$0xff]  ;;  %s523_s24 = sshll.u32 %s800_s15, 7  ;;  %s288_s5 = scalar_lea.vmem [#allocation8], %s518_s7 }
  0x79   : > { %v309_v6 = vpack.c.bf16 %v295_v5, %v294_v3  ;;  %v297_v8 = vld [vmem:[%s1036_s29 + $0x28] sm:$0xff]  ;;  %v298_v10 = vld [vmem:[%s1036_s29 + $0x30] sm:$0xff]  ;;  %v299_v11 = vld [vmem:[%s1036_s29 + $0x38] sm:$0xff]  ;;  %s380_s1 = sshll.u32 %s288_s5, 4  ;;  %s1066_s23 = scalar_lea.hbm %s1118_s3, %s523_s24  ;;  %s1068_s1 = int_to_ptr.vmem [resolvable:$true] %s380_s1 }
  0x7a   : > { %537 = vmatpush3.bf16.msra.mxu0 %v308_v4  ;;  %v310_v9 = vpack.c.bf16 %v297_v8, %v296_v7  ;;  %v311_v12 = vpack.c.bf16 %v299_v11, %v298_v10  ;;  %v300_v13 = vld [vmem:[%s1036_s29 + $0x40] sm:$0xff]  ;;  %v301_v14 = vld [vmem:[%s1036_s29 + $0x48] sm:$0xff]  ;;  %v302_v16 = vld [vmem:[%s1036_s29 + $0x50] sm:$0xff]  ;;  %s365_s15 = scalar_lea.sflag [#allocation4], %s1022_s21  ;;  %s722_s28 = scalar_lea.vmem %s1068_s1, 128 }
  0x7b   : > { %538 = vmatprep.subr.bf16.mxu0 %v815_v0  ;;  %v312_v15 = vpack.c.bf16 %v301_v14, %v300_v13  ;;  %v303_v17 = vld [vmem:[%s1036_s29 + $0x58] sm:$0xff]  ;;  %v304_v19 = vld [vmem:[%s1036_s29 + $0x60] sm:$0xff]  ;;  %v305_v20 = vld [vmem:[%s1036_s29 + $0x68] sm:$0xff]  ;;  %p723_p2 = scmp.ne.s32.totalorder %s1068_s1, %s722_s28  ;;  %p1136_p6 = scmp.ne.s32.totalorder %s1127_s25, 0 }
  0x7c   : > { %v313_v18 = vpack.c.bf16 %v303_v17, %v302_v16  ;;  %v314_v21 = vpack.c.bf16 %v305_v20, %v304_v19  ;;  %v306_v22 = vld [vmem:[%s1036_s29 + $0x70] sm:$0xff]  ;;  %v307_v23 = vld [vmem:[%s1036_s29 + $0x78] sm:$0xff]  ;;  %s817_s8 = smov [#allocation8]  }
  0x7d   : > { %v315_v24 = vpack.c.bf16 %v307_v23, %v306_v22  ;;  %v290_v25 = vld [vmem:[%s1028_s22] sm:$0xff]  ;;  %p724_p12 = pnand %p723_p2, %p1136_p6  ;;  %s726_s19 = sshll.u32 %s817_s8, 4  ;;  %s727_s19 = int_to_ptr.vmem [resolvable:$false] %s726_s19 }
  0x7e   : > { %539 = vmatpush3.bf16.msra.mxu0 %v309_v6  ;;  %v291_v26 = vpack.c.bf16 %v290_v25, %v290_v25  ;;  %v521_v27 = vld [vmem:[%s257_s18] ss:$0 sm:$0xff]  ;;  %s728_s6 = scalar_lea.vmem %s727_s19, 256  ;;  %p729_p9 = scmp.lt.s32.totalorder %s1068_s1, %s727_s19 }
  0x7f   : > { %540 = vmatprep.subr.bf16.mxu0 %v815_v0  ;;  %p725_p4 = pneg %p724_p12  ;;  %p730_p11 = scmp.lt.s32.totalorder %s728_s6, %s722_s28 }
  0x81   : > { %p731_p10 = por %p730_p11, %p729_p9 }
  0x82   : > { %541 = vmatpush3.bf16.msra.mxu0 %v310_v9 }
  0x83   : > { %542 = vmatprep.subr.bf16.mxu0 %v815_v0  ;;  %p732_p13 = pnand %p731_p10, %p725_p4 }
  0x86   : > { %543 = vmatpush3.bf16.msra.mxu0 %v311_v12 }
  0x87   : > { %544 = vmatprep.subr.bf16.mxu0 %v815_v0 }
  0x8a   : > { %545 = vmatpush3.bf16.msra.mxu0 %v312_v15 }
  0x8b   : > { %546 = vmatprep.subr.bf16.mxu0 %v815_v0 }
  0x8e   : > { %547 = vmatpush3.bf16.msra.mxu0 %v313_v18 }
  0x8f   : > { %548 = vmatprep.subr.bf16.mxu0 %v815_v0 }
  0x92   : > { %549 = vmatpush3.bf16.msra.mxu0 %v314_v21 }
  0x93   : > { %550 = vmatprep.subr.bf16.mxu0 %v815_v0 }
  0x96   : > { %551 = vmatpush3.bf16.msra.mxu0 %v315_v24 }
  0x99   : > { %553 = vmatmul.mubr.bf16.vlgmr.msra.gmra.mrb[0].mxu0 %v291_v26 }
 0x16c   : > { %v357_v28 = vpop.f32.mrb[0].mxu0 }
 0x16d   : > { %v358_v29 = vadd.f32 %v521_v27, %v357_v28  ;;  %v554_v30 = vpop.f32.mrb[1].mxu0 }
 0x16e   : > { %v360_v31 = vpop.f32.mrb[2].mxu0 }
 0x16f   : > { %363 = vst [vmem:[%s288_s5] sm:$0xff] %v358_v29  ;;  %v555_v32 = vpop.f32.mrb[3].mxu0 }
 0x170   : > { %735 = shalt.err (!%p732_p13)
}
 0x171   : > { %s736_s21 = scalar_lea.hbm %s1066_s23, 128  ;;  %s740_s22 = scalar_lea.hbm %s1118_s3, 256 }
 0x172   : > { %p737_p8 = scmp.ne.s32.totalorder %s1066_s23, %s736_s21  ;;  %p741_p5 = scmp.lt.u32.totalorder %s1066_s23, %s1118_s3 }
 0x173   : > { %p742_p1 = scmp.lt.u32.totalorder %s740_s22, %s736_s21  ;;  %p744_p2 = scmp.lt.u32.totalorder %s736_s21, %s1066_s23 }
 0x174   : > { %p738_p7 = pnand %p737_p8, %p1136_p6 }
 0x175   : > { %p743_p0 = por %p742_p1, %p741_p5 }
 0x176   : > { %p739_p3 = pneg %p738_p7 }
 0x177   : > { %p745_p12 = por %p744_p2, %p743_p0 }
 0x179   : > { %p746_p4 = pnand %p745_p12, %p739_p3 }
 0x17b   : > { %749 = shalt.err (!%p746_p4)
}
 0x17c   : > { %562 = dma.vmem_to_hbm [thread:$0]  (%p1136_p6), %s1068_s1, 128, %s1066_s23, %s365_s15  }
 0x17d PF: > { %s392_s30 = sand.u32 1, %s788_s12   ;;  %p1137_p9 = scmp.ne.s32.totalorder %s1128_s27, 0 }
 0x17e   : > { %p1138_p11 = scmp.ge.s32.totalorder %s808_s17, 2  ;;  %s393_s29 = scalar_lea.sflag [#allocation4], %s392_s30 }
 0x180   : > { %p575_p10 = pnand %p1138_p11, %p1137_p9 }
 0x182   : > { %783 = dma.done.wait (!%p575_p10), %s393_s29, 128  }
 0x183   : > { %785 = vsyncadd (!%p575_p10), %s393_s29, 4294967168  ;;  %s22_s17 = sadd.s32 1, %s808_s17   ;;  %s1139_s25 = sld [smem:[#allocation12_spill]] }
 0x184   : > { %p19_p13 = scmp.ge.s32.totalorder %s22_s17, 4   ;;  %s1140_s12 = smov %s792_s13 }
 0x185   : > { %s1141_s13 = smov %s796_s14  ;;  %s1142_s14 = smov %s898_s26 }
 0x186   : > { %s1143_s15 = smov %s804_s16  ;;  %21 = sbr.rel (!%p19_p13) target bundleno = 10 (0xa), region = 101 }
 0x189   : > { %s1144_s16 = smov %s1139_s25 }
 0x18d   :  { %398 = vsyncpa [#allocation3], 1 }
 0x18e   :  { %400 = vsyncpa [#allocation3 + $0x1], 1 }
 0x18f   :  { %401 = vsyncpa [#allocation6], 1 }
 0x190   :  { %403 = vsyncpa [#allocation6 + $0x1], 1 }
 0x191   :  { %404 = vsyncpa [#allocation4], 1 }
 0x192   :  { %406 = vsyncpa [#allocation4 + $0x1], 1 }

</bundles_post_ra>
